<compile_context>
chip_gen: v7x
topology: tpu7x:2x2x1
jax: 0.10.0
libtpu: 0.0.40
codegen_flags: <defaults>
</compile_context>

<pallas_src>
import jax
import jax.numpy as jnp
from jax.experimental import pallas as pl
from jax.experimental.pallas import tpu as pltpu


# --------------------------------------------------------------------------
# Fused Pallas kernel: whole network, one example per grid step
# --------------------------------------------------------------------------

def _fused_kernel(mp_ref, wc_ref, bc_ref, wl_ref, bl_ref, wg_ref, bg_ref,
                  hsel_ref, hb_ref, o_ref):
    """Per-example fused forward.

    mp_ref   : (64, 64)   patch matrix of m = outer(u, v) for the composite
                          8x8/stride-8 conv (row = output pixel r*8+t,
                          col = tap a*8+b).
    wc_ref   : (64, 32)   composite conv weight (in_layer∘sec_layer∘trd_layer).
    bc_ref   : (1, 32)    composite conv bias.
    wl/bl    : (32,32)/(1,32)  HSFM local 1x1 conv with BatchNorm folded.
    wg/bg    : (32,32)/(1,32)  HSFM global 1x1 conv with BatchNorm folded.
    hsel_ref : (n_chunk, 64)   head selector (view/sum/fc1/@P^T/out_layer composed).
    hb_ref   : (1, 1)     composed head bias.
    o_ref    : (n_chunk, 32)   sigmoid predictions for this example.
    """
    # --- conv stack: in_layer -> sec_layer -> trd_layer (one MXU matmul) ---
    y = jnp.dot(mp_ref[...], wc_ref[...],
                preferred_element_type=jnp.float32) + bc_ref[...]        # (64, 32)

    # --- in_drop (eval: identity) + in_relu ---
    x = jnp.maximum(y, 0.0)

    # --- HSFM ---
    xa = x + y
    xl = jnp.dot(xa, wl_ref[...], preferred_element_type=jnp.float32) + bl_ref[...]
    xl = jnp.maximum(xl, 0.0)                                            # local att
    pooled = jnp.mean(xa, axis=0, keepdims=True)                         # (1, 32)
    xg = jnp.dot(pooled, wg_ref[...], preferred_element_type=jnp.float32) + bg_ref[...]
    xg = jnp.maximum(xg, 0.0)                                            # global att
    wei = jax.nn.sigmoid(xl + xg)                                        # broadcast
    xi = x * wei + y * (1.0 - wei)                                       # (64, 32)

    # --- head: view(256,-1,2,2).sum(1) -> fc1 -> @P^T -> out_drp(eval) ->
    #     out_layer -> sigmoid, all composed into hsel / hb ---
    s = jnp.dot(hsel_ref[...], xi, preferred_element_type=jnp.float32)   # (n_chunk, 32)
    o_ref[...] = jax.nn.sigmoid(s + hb_ref[...])


# --------------------------------------------------------------------------
# Parameter construction / eval-mode folding
# --------------------------------------------------------------------------

def fold_bn(w_mat, b_conv, gamma, beta, mean, var, eps=1e-5):
    """Fold eval-mode BatchNorm into a (C_in, C_out) matmul weight + bias."""
    scale = gamma / jnp.sqrt(var + eps)
    return w_mat * scale[None, :], (b_conv - mean) * scale + beta


def init_params(key, user_count, item_count):
    ks = jax.random.split(key, 32)

    def rn(k, shape, scale=0.05):
        return jax.random.normal(k, shape, dtype=jnp.float32) * scale

    p = {}
    p["P"] = rn(ks[0], (user_count, 64), 0.1)
    p["Q"] = rn(ks[1], (item_count, 64), 0.1)

    # conv stack (PyTorch layout: C_out, C_in, kH, kW)
    p["w_in"] = rn(ks[2], (64, 3, 2, 2));   p["b_in"] = rn(ks[3], (64,))
    p["w_sec"] = rn(ks[4], (64, 64, 2, 2)); p["b_sec"] = rn(ks[5], (64,))
    p["w_trd"] = rn(ks[6], (32, 64, 2, 2)); p["b_trd"] = rn(ks[7], (32,))

    # --- eval-mode conv composition ---------------------------------------
    # cat([m,m,m],1): all 3 input channels identical -> sum weight over C_in.
    w1s = p["w_in"].sum(axis=1)                                      # (64, 2, 2)
    # Two stride-2 2x2 convs with no nonlinearity between them compose into a
    # stride-4 4x4 conv; with the third into a single stride-8 8x8 conv.
    w12 = jnp.einsum("ocij,ckl->oikjl", p["w_sec"], w1s).reshape(64, 4, 4)
    b12 = p["b_sec"] + p["w_sec"].sum(axis=(2, 3)) @ p["b_in"]
    w123 = jnp.einsum("ocij,ckl->oikjl", p["w_trd"], w12).reshape(32, 8, 8)
    b123 = p["b_trd"] + p["w_trd"].sum(axis=(2, 3)) @ b12
    p["w_conv"] = jnp.transpose(w123, (1, 2, 0)).reshape(64, 32)     # (tap, C)
    p["b_conv"] = b123                                               # (32,)

    # --- HSFM local/global 1x1 convs + BatchNorm (eval-mode stats), folded --
    p["wl"] = rn(ks[8], (32, 32, 1, 1));  p["bl_raw"] = rn(ks[9], (32,))
    p["wg"] = rn(ks[10], (32, 32, 1, 1)); p["bg_raw"] = rn(ks[11], (32,))
    p["gl"] = 1.0 + 0.1 * jax.random.normal(ks[12], (32,)); p["betal"] = rn(ks[13], (32,))
    p["ml"] = rn(ks[14], (32,))
    p["vl"] = 1.0 + 0.1 * jnp.abs(jax.random.normal(ks[15], (32,)))
    p["gg"] = 1.0 + 0.1 * jax.random.normal(ks[16], (32,)); p["betag"] = rn(ks[17], (32,))
    p["mg"] = rn(ks[18], (32,))
    p["vg"] = 1.0 + 0.1 * jnp.abs(jax.random.normal(ks[19], (32,)))
    p["wl_fold"], p["bl_fold"] = fold_bn(jnp.transpose(p["wl"][:, :, 0, 0]),
                                         p["bl_raw"], p["gl"], p["betal"],
                                         p["ml"], p["vl"])
    p["wg_fold"], p["bg_fold"] = fold_bn(jnp.transpose(p["wg"][:, :, 0, 0]),
                                         p["bg_raw"], p["gg"], p["betag"],
                                         p["mg"], p["vg"])

    # --- head (PyTorch layouts) --------------------------------------------
    p["fc1_w"] = rn(ks[20], (64, 4));         p["fc1_b"] = rn(ks[21], (64,))
    p["out_w"] = rn(ks[22], (1, user_count)); p["out_b"] = rn(ks[23], (1,))
    # Composed head (eval-mode exact: Dropout identity, no nonlinearity between
    # fc1 -> @P^T -> out_layer):
    PT = jnp.transpose(p["P"])                                # (64, U)
    W3 = jnp.transpose(p["out_w"])                            # (U, 1)
    p["head_w"] = jnp.transpose(p["fc1_w"]) @ PT @ W3         # (4, 1)
    p["head_b"] = p["fc1_b"] @ PT @ W3 + p["out_b"]           # (1,)
    return p


# --------------------------------------------------------------------------
# Forward pass
# --------------------------------------------------------------------------

def model_forward(params, user_ids, item_ids):
    u_emb = params["P"][user_ids]                             # (B, 64) embedding lookup
    i_emb = params["Q"][item_ids]                             # (B, 64)
    B = u_emb.shape[0]
    # TODO(synk): the in-kernel head reduction assumes 8*B <= 64 and 256 % B == 0
    # (i.e. B in {1,2,4,8}); other batch sizes would need a wrapper-side head.
    assert 8 * B <= 64 and 256 % B == 0, B
    n_chunk = 64 // (8 * B)        # spatial chunks per channel per output row
    C = 32

    # Patch matrix of m = outer(u, v) for the composite 8x8/stride-8 conv:
    # mp[b, r*8+t, a*8+c] = u[b, 8r+a] * v[b, 8t+c].  16 KB per example.
    u_blk = u_emb.reshape(B, 8, 8)
    v_blk = i_emb.reshape(B, 8, 8)
    mp = (u_blk[:, :, None, :, None] * v_blk[:, None, :, None, :]).reshape(B, 64, 64)
    mp = mp.astype(jnp.float32)

    # Head selector: hsel[chunk, hw] = head_w[hw % 4] if hw // (8B) == chunk else 0.
    hw_base = jnp.tile(params["head_w"].reshape(-1), 64 // 4)                # (64,)
    in_chunk = (jnp.arange(64)[None, :] // (8 * B)) == jnp.arange(n_chunk)[:, None]
    hsel = jnp.where(in_chunk, hw_base[None, :], 0.0).astype(jnp.float32)    # (n_chunk, 64)

    out = pl.pallas_call(
        _fused_kernel,
        out_shape=jax.ShapeDtypeStruct((B, n_chunk, C), jnp.float32),
        grid_spec=pltpu.PrefetchScalarGridSpec(
            num_scalar_prefetch=0,
            grid=(B,),
            in_specs=[
                pl.BlockSpec((None, 64, 64), lambda b: (b, 0, 0)),   # mp (per example)
                pl.BlockSpec((64, C), lambda b: (0, 0)),             # w_conv
                pl.BlockSpec((1, C), lambda b: (0, 0)),              # b_conv
                pl.BlockSpec((C, C), lambda b: (0, 0)),              # wl_fold
                pl.BlockSpec((1, C), lambda b: (0, 0)),              # bl_fold
                pl.BlockSpec((C, C), lambda b: (0, 0)),              # wg_fold
                pl.BlockSpec((1, C), lambda b: (0, 0)),              # bg_fold
                pl.BlockSpec((n_chunk, 64), lambda b: (0, 0)),       # head selector
                pl.BlockSpec((1, 1), lambda b: (0, 0)),              # head bias
            ],
            out_specs=pl.BlockSpec((None, n_chunk, C), lambda b: (b, 0, 0)),
        ),
        compiler_params=pltpu.CompilerParams(
            dimension_semantics=("parallel",)),
    )(mp,
      params["w_conv"],
      params["b_conv"].reshape(1, C),
      params["wl_fold"],
      params["bl_fold"].reshape(1, C),
      params["wg_fold"],
      params["bg_fold"].reshape(1, C),
      hsel,
      params["head_b"].reshape(1, 1))

    # out[b, chunk, c] -> flat prediction index b*(256/B) + c*n_chunk + chunk.
    return jnp.transpose(out, (0, 2, 1)).reshape(-1)          # (256,)


# --------------------------------------------------------------------------
# Plain-JAX reference (unfused transcription of the PyTorch forward, eval mode)
# --------------------------------------------------------------------------

def reference_forward(params, user_ids, item_ids):
    u_emb = params["P"][user_ids]
    i_emb = params["Q"][item_ids]
    m = u_emb[:, :, None] * i_emb[:, None, :]                 # (B, 64, 64)
    x = jnp.stack([m, m, m], axis=1)                          # (B, 3, 64, 64)

    def conv2x2_s2(z, w, b):
        z = jax.lax.conv_general_dilated(
            z, w, window_strides=(2, 2), padding="VALID",
            dimension_numbers=("NCHW", "OIHW", "NCHW"))
        return z + b[None, :, None, None]

    x = conv2x2_s2(x, params["w_in"], params["b_in"])
    x = conv2x2_s2(x, params["w_sec"], params["b_sec"])
    x = conv2x2_s2(x, params["w_trd"], params["b_trd"])
    y = x
    x = jnp.maximum(x, 0.0)                                   # in_drop(eval) + relu

    def bn_eval(z, gamma, beta, mean, var, eps=1e-5):
        scale = (gamma / jnp.sqrt(var + eps))[None, :, None, None]
        return (z - mean[None, :, None, None]) * scale + beta[None, :, None, None]

    def conv1x1(z, w, b):
        return jnp.einsum("bchw,oc->bohw", z, w[:, :, 0, 0]) + b[None, :, None, None]

    xa = x + y
    xl = jnp.maximum(bn_eval(conv1x1(xa, params["wl"], params["bl_raw"]),
                             params["gl"], params["betal"], params["ml"],
                             params["vl"]), 0.0)
    pooled = jnp.mean(xa, axis=(2, 3), keepdims=True)
    xg = jnp.maximum(bn_eval(conv1x1(pooled, params["wg"], params["bg_raw"]),
                             params["gg"], params["betag"], params["mg"],
                             params["vg"]), 0.0)
    wei = jax.nn.sigmoid(xl + xg)
    xi = x * wei + y * (1.0 - wei)                            # (B, 32, 8, 8)

    h = xi.reshape(256, -1, 2, 2).sum(axis=1).reshape(256, 4)
    h = h @ params["fc1_w"].T + params["fc1_b"]
    h = h @ params["P"].T
    h = h @ params["out_w"].T + params["out_b"]
    return jax.nn.sigmoid(h).reshape(-1)


if __name__ == "__main__":
    key = jax.random.PRNGKey(0)
    pkey, ukey, ikey = jax.random.split(key, 3)

    user_count, item_count, batch = 8, 8, 4
    params = init_params(pkey, user_count, item_count)
    user_ids = jax.random.randint(ukey, (batch,), 0, user_count)
    item_ids = jax.random.randint(ikey, (batch,), 0, item_count)

    fwd = jax.jit(model_forward)
    pred = jax.block_until_ready(fwd(params, user_ids, item_ids))

    assert pred.shape == (256,), pred.shape
    assert bool(jnp.all(jnp.isfinite(pred)))
    assert bool(jnp.all((pred >= 0.0) & (pred <= 1.0)))

    # Cross-check the fused Pallas kernel against the layer-by-layer reference.
    ref = jax.block_until_ready(jax.jit(reference_forward)(params, user_ids, item_ids))
    assert bool(jnp.allclose(pred, ref, atol=1e-4, rtol=1e-3)), (
        float(jnp.max(jnp.abs(pred - ref))))

    print("KERNEL_OK")
</pallas_src>

<mosaic_0001>
module attributes {stable_mosaic.version = 11 : i64} {
  func.func @_fused_kernel(%arg0: i32, %arg1: memref<1x64x64xf32, #tpu.memory_space<vmem>>, %arg2: memref<64x32xf32, #tpu.memory_space<vmem>>, %arg3: memref<1x32xf32, #tpu.memory_space<vmem>>, %arg4: memref<32x32xf32, #tpu.memory_space<vmem>>, %arg5: memref<1x32xf32, #tpu.memory_space<vmem>>, %arg6: memref<32x32xf32, #tpu.memory_space<vmem>>, %arg7: memref<1x32xf32, #tpu.memory_space<vmem>>, %arg8: memref<2x64xf32, #tpu.memory_space<vmem>>, %arg9: memref<1x1xf32, #tpu.memory_space<vmem>>, %arg10: memref<1x2x32xf32, #tpu.memory_space<vmem>>) attributes {dimension_semantics = [#tpu.dimension_semantics<parallel>], iteration_bounds = array<i64: 4>, scalar_prefetch = 0 : i64, scratch_operands = 0 : i64, tpu.core_type = #tpu.core_type<tc>, window_params = [{transform_indices = @transform_0, window_bounds = array<i64: 1, 64, 64>}, {pipeline_mode = #tpu.pipeline_mode<synchronous>, transform_indices = @transform_1, window_bounds = array<i64: 64, 32>}, {pipeline_mode = #tpu.pipeline_mode<synchronous>, transform_indices = @transform_2, window_bounds = array<i64: 1, 32>}, {pipeline_mode = #tpu.pipeline_mode<synchronous>, transform_indices = @transform_3, window_bounds = array<i64: 32, 32>}, {pipeline_mode = #tpu.pipeline_mode<synchronous>, transform_indices = @transform_4, window_bounds = array<i64: 1, 32>}, {pipeline_mode = #tpu.pipeline_mode<synchronous>, transform_indices = @transform_5, window_bounds = array<i64: 32, 32>}, {pipeline_mode = #tpu.pipeline_mode<synchronous>, transform_indices = @transform_6, window_bounds = array<i64: 1, 32>}, {pipeline_mode = #tpu.pipeline_mode<synchronous>, transform_indices = @transform_7, window_bounds = array<i64: 2, 64>}, {pipeline_mode = #tpu.pipeline_mode<synchronous>, transform_indices = @transform_8, window_bounds = array<i64: 1, 1>}, {transform_indices = @transform_9, window_bounds = array<i64: 1, 2, 32>}]} {
    %c0 = arith.constant 0 : index
    %c0_0 = arith.constant 0 : index
    %c0_1 = arith.constant 0 : index
    %0 = vector.load %arg1[%c0, %c0_0, %c0_1] : memref<1x64x64xf32, #tpu.memory_space<vmem>>, vector<1x64x64xf32>
    %1 = vector.shape_cast %0 : vector<1x64x64xf32> to vector<64x64xf32>
    %c0_2 = arith.constant 0 : index
    %c0_3 = arith.constant 0 : index
    %2 = vector.load %arg2[%c0_2, %c0_3] : memref<64x32xf32, #tpu.memory_space<vmem>>, vector<64x32xf32>
    %cst = arith.constant dense<0.000000e+00> : vector<64x32xf32>
    %3 = tpu.matmul %1, %2, %cst {dimension_numbers = #tpu.dot_dimension_numbers<[1], [0], [0], [1], [0, 0, 1, 1], [], []>} : vector<64x64xf32>, vector<64x32xf32>, vector<64x32xf32> -> vector<64x32xf32>
    %c0_4 = arith.constant 0 : index
    %c0_5 = arith.constant 0 : index
    %4 = vector.load %arg3[%c0_4, %c0_5] : memref<1x32xf32, #tpu.memory_space<vmem>>, vector<1x32xf32>
    %5 = vector.broadcast %4 : vector<1x32xf32> to vector<64x32xf32>
    %6 = arith.addf %3, %5 : vector<64x32xf32>
    %cst_6 = arith.constant 0.000000e+00 : f32
    %7 = vector.broadcast %cst_6 : f32 to vector<64x32xf32>
    %8 = arith.maximumf %6, %7 : vector<64x32xf32>
    %9 = arith.addf %8, %6 : vector<64x32xf32>
    %c0_7 = arith.constant 0 : index
    %c0_8 = arith.constant 0 : index
    %10 = vector.load %arg4[%c0_7, %c0_8] : memref<32x32xf32, #tpu.memory_space<vmem>>, vector<32x32xf32>
    %cst_9 = arith.constant dense<0.000000e+00> : vector<64x32xf32>
    %11 = tpu.matmul %9, %10, %cst_9 {dimension_numbers = #tpu.dot_dimension_numbers<[1], [0], [0], [1], [0, 0, 1, 1], [], []>} : vector<64x32xf32>, vector<32x32xf32>, vector<64x32xf32> -> vector<64x32xf32>
    %c0_10 = arith.constant 0 : index
    %c0_11 = arith.constant 0 : index
    %12 = vector.load %arg5[%c0_10, %c0_11] : memref<1x32xf32, #tpu.memory_space<vmem>>, vector<1x32xf32>
    %13 = vector.broadcast %12 : vector<1x32xf32> to vector<64x32xf32>
    %14 = arith.addf %11, %13 : vector<64x32xf32>
    %cst_12 = arith.constant 0.000000e+00 : f32
    %15 = vector.broadcast %cst_12 : f32 to vector<64x32xf32>
    %16 = arith.maximumf %14, %15 : vector<64x32xf32>
    %cst_13 = arith.constant dense<0.000000e+00> : vector<32xf32>
    %17 = vector.multi_reduction <add>, %9, %cst_13 [0] : vector<64x32xf32> to vector<32xf32>
    %18 = vector.shape_cast %17 : vector<32xf32> to vector<1x32xf32>
    %cst_14 = arith.constant 6.400000e+01 : f32
    %19 = vector.broadcast %cst_14 : f32 to vector<1x32xf32>
    %20 = arith.divf %18, %19 : vector<1x32xf32>
    %c0_15 = arith.constant 0 : index
    %c0_16 = arith.constant 0 : index
    %21 = vector.load %arg6[%c0_15, %c0_16] : memref<32x32xf32, #tpu.memory_space<vmem>>, vector<32x32xf32>
    %cst_17 = arith.constant dense<0.000000e+00> : vector<1x32xf32>
    %22 = tpu.matmul %20, %21, %cst_17 {dimension_numbers = #tpu.dot_dimension_numbers<[1], [0], [0], [1], [0, 0, 1, 1], [], []>} : vector<1x32xf32>, vector<32x32xf32>, vector<1x32xf32> -> vector<1x32xf32>
    %c0_18 = arith.constant 0 : index
    %c0_19 = arith.constant 0 : index
    %23 = vector.load %arg7[%c0_18, %c0_19] : memref<1x32xf32, #tpu.memory_space<vmem>>, vector<1x32xf32>
    %24 = arith.addf %22, %23 : vector<1x32xf32>
    %cst_20 = arith.constant 0.000000e+00 : f32
    %25 = vector.broadcast %cst_20 : f32 to vector<1x32xf32>
    %26 = arith.maximumf %24, %25 : vector<1x32xf32>
    %27 = vector.broadcast %26 : vector<1x32xf32> to vector<64x32xf32>
    %28 = arith.addf %16, %27 : vector<64x32xf32>
    %29 = arith.negf %28 : vector<64x32xf32>
    %30 = math.exp %29 : vector<64x32xf32>
    %cst_21 = arith.constant 1.000000e+00 : f32
    %31 = vector.broadcast %cst_21 : f32 to vector<64x32xf32>
    %32 = arith.addf %31, %30 : vector<64x32xf32>
    %33 = arith.divf %31, %32 : vector<64x32xf32>
    %34 = arith.mulf %8, %33 : vector<64x32xf32>
    %cst_22 = arith.constant 1.000000e+00 : f32
    %35 = vector.broadcast %cst_22 : f32 to vector<64x32xf32>
    %36 = arith.subf %35, %33 : vector<64x32xf32>
    %37 = arith.mulf %6, %36 : vector<64x32xf32>
    %38 = arith.addf %34, %37 : vector<64x32xf32>
    %c0_23 = arith.constant 0 : index
    %c0_24 = arith.constant 0 : index
    %39 = vector.load %arg8[%c0_23, %c0_24] : memref<2x64xf32, #tpu.memory_space<vmem>>, vector<2x64xf32>
    %cst_25 = arith.constant dense<0.000000e+00> : vector<2x32xf32>
    %40 = tpu.matmul %39, %38, %cst_25 {dimension_numbers = #tpu.dot_dimension_numbers<[1], [0], [0], [1], [0, 0, 1, 1], [], []>} : vector<2x64xf32>, vector<64x32xf32>, vector<2x32xf32> -> vector<2x32xf32>
    %c0_26 = arith.constant 0 : index
    %c0_27 = arith.constant 0 : index
    %41 = vector.load %arg9[%c0_26, %c0_27] : memref<1x1xf32, #tpu.memory_space<vmem>>, vector<1x1xf32>
    %42 = vector.broadcast %41 : vector<1x1xf32> to vector<2x32xf32>
    %43 = arith.addf %40, %42 : vector<2x32xf32>
    %44 = arith.negf %43 : vector<2x32xf32>
    %45 = math.exp %44 : vector<2x32xf32>
    %cst_28 = arith.constant 1.000000e+00 : f32
    %46 = vector.broadcast %cst_28 : f32 to vector<2x32xf32>
    %47 = arith.addf %46, %45 : vector<2x32xf32>
    %48 = arith.divf %46, %47 : vector<2x32xf32>
    %c0_29 = arith.constant 0 : index
    %c0_30 = arith.constant 0 : index
    %c0_31 = arith.constant 0 : index
    %49 = vector.load %arg10[%c0_29, %c0_30, %c0_31] : memref<1x2x32xf32, #tpu.memory_space<vmem>>, vector<1x2x32xf32>
    %50 = vector.shape_cast %49 : vector<1x2x32xf32> to vector<2x32xf32>
    %51 = vector.shape_cast %48 : vector<2x32xf32> to vector<1x2x32xf32>
    tpu.vector_store %arg10[%c0_29, %c0_30, %c0_31], %51 {strides = array<i32>} : memref<1x2x32xf32, #tpu.memory_space<vmem>>, vector<1x2x32xf32>,
    return
  }
  func.func @transform_0(%arg0: i32) -> (i32, i32, i32) {
    %c0_i32 = arith.constant 0 : i32
    %c0_i32_0 = arith.constant 0 : i32
    %c0_i32_1 = arith.constant 0 : i32
    return %arg0, %c0_i32, %c0_i32_0 : i32, i32, i32
  }
  func.func @transform_1(%arg0: i32) -> (i32, i32) {
    %c0_i32 = arith.constant 0 : i32
    %c0_i32_0 = arith.constant 0 : i32
    %c0_i32_1 = arith.constant 0 : i32
    return %c0_i32, %c0_i32_0 : i32, i32
  }
  func.func @transform_2(%arg0: i32) -> (i32, i32) {
    %c0_i32 = arith.constant 0 : i32
    %c0_i32_0 = arith.constant 0 : i32
    %c0_i32_1 = arith.constant 0 : i32
    return %c0_i32, %c0_i32_0 : i32, i32
  }
  func.func @transform_3(%arg0: i32) -> (i32, i32) {
    %c0_i32 = arith.constant 0 : i32
    %c0_i32_0 = arith.constant 0 : i32
    %c0_i32_1 = arith.constant 0 : i32
    return %c0_i32, %c0_i32_0 : i32, i32
  }
  func.func @transform_4(%arg0: i32) -> (i32, i32) {
    %c0_i32 = arith.constant 0 : i32
    %c0_i32_0 = arith.constant 0 : i32
    %c0_i32_1 = arith.constant 0 : i32
    return %c0_i32, %c0_i32_0 : i32, i32
  }
  func.func @transform_5(%arg0: i32) -> (i32, i32) {
    %c0_i32 = arith.constant 0 : i32
    %c0_i32_0 = arith.constant 0 : i32
    %c0_i32_1 = arith.constant 0 : i32
    return %c0_i32, %c0_i32_0 : i32, i32
  }
  func.func @transform_6(%arg0: i32) -> (i32, i32) {
    %c0_i32 = arith.constant 0 : i32
    %c0_i32_0 = arith.constant 0 : i32
    %c0_i32_1 = arith.constant 0 : i32
    return %c0_i32, %c0_i32_0 : i32, i32
  }
  func.func @transform_7(%arg0: i32) -> (i32, i32) {
    %c0_i32 = arith.constant 0 : i32
    %c0_i32_0 = arith.constant 0 : i32
    %c0_i32_1 = arith.constant 0 : i32
    return %c0_i32, %c0_i32_0 : i32, i32
  }
  func.func @transform_8(%arg0: i32) -> (i32, i32) {
    %c0_i32 = arith.constant 0 : i32
    %c0_i32_0 = arith.constant 0 : i32
    %c0_i32_1 = arith.constant 0 : i32
    return %c0_i32, %c0_i32_0 : i32, i32
  }
  func.func @transform_9(%arg0: i32) -> (i32, i32, i32) {
    %c0_i32 = arith.constant 0 : i32
    %c0_i32_0 = arith.constant 0 : i32
    %c0_i32_1 = arith.constant 0 : i32
    return %arg0, %c0_i32, %c0_i32_0 : i32, i32, i32
  }
}

</mosaic_0001>

<bundles_post_ra>
// kernel: mul.11
= control target key start
LH: loop header
LB: loop body
LE: loop exit
PB: predicated region body
PF: predicated region fallthrough
CT: control target
= control target key end

     0   :  { %s66_s8 = smov 104   ;;  %vm7_vm0 = vcmask 64512   ;;  %s67_s11 = smov 112   ;;  %s117_s0 = inlined_call_operand.vmem [shape: f32[4,64], index: 0, kind: input, shape index: {}]   ;;  %s118_s1 = inlined_call_operand.vmem [shape: f32[4,8,8], index: 1, kind: output, shape index: {}]  }
   0x1   :  { %v4_v0 = vld [vmem:[%s117_s0] sm:$0xf]  ;;  %s65_s0 = smov 120   ;;  %s68_s12 = smov 96  }
   0x2   :  { %5 = vst [vmem:[#allocation0] sm:$0xf] %v4_v0  ;;  %s69_s13 = smov 88   ;;  %s70_s14 = smov 80  }
   0x3   :  { %s71_s15 = smov 72  }
   0x9   :  { %v9_v1 = vld [vmem:[#allocation0] sm:$0xf]  }
   0xa   :  { %v21_v2 = vld [vmem:[#allocation0] sm:$0xf]   ;;  %10 = vrot.lane.b32.xlu0 %v9_v1, %s65_s0 }
   0xb   :  { %22 = vrot.lane.b32.xlu1 %v21_v2, %s66_s8  ;;  %v15_v3 = vld [vmem:[#allocation0] sm:$0xf]  }
   0xc   :  { %v27_v4 = vld [vmem:[#allocation0] sm:$0xf]  }
   0xd   :  { %v6_v5 = vld [vmem:[#allocation0] sm:$0xf]  }
   0xe   :  { %8 = vst.msk [vmem:[%s118_s1] ss:$8 sm:$0xf] %vm7_vm0, %v6_v5   ;;  %16 = vrot.lane.b32.xlu0 %v15_v3, %s67_s11  ;;  %v33_v6 = vld [vmem:[#allocation0] sm:$0xf]  }
   0xf   :  { %28 = vrot.lane.b32.xlu1 %v27_v4, %s68_s12  ;;  %v39_v7 = vld [vmem:[#allocation0] sm:$0xf]  }
  0x10   :  { %v45_v8 = vld [vmem:[#allocation0] sm:$0xf]  }
  0x12   :  { %34 = vrot.lane.b32.xlu0 %v33_v6, %s69_s13 }
  0x13   :  { %40 = vrot.lane.b32.xlu1 %v39_v7, %s70_s14 }
  0x16   :  { %46 = vrot.lane.b32.xlu0 %v45_v8, %s71_s15 }
  0x7c   :  { %v11_v9 = vpop.permute.xlu0 %10  }
  0x7d   :  { %v23_v10 = vpop.permute.xlu1 %22   ;;  %51 = vst.msk [vmem:[%s118_s1 + $0x1] ss:$8 sm:$0xf] %vm7_vm0, %v11_v9  }
  0x7e   :  { %53 = vst.msk [vmem:[%s118_s1 + $0x3] ss:$8 sm:$0xf] %vm7_vm0, %v23_v10  }
  0x80   :  { %v17_v11 = vpop.permute.xlu0 %16  }
  0x81   :  { %v29_v12 = vpop.permute.xlu1 %28   ;;  %52 = vst.msk [vmem:[%s118_s1 + $0x2] ss:$8 sm:$0xf] %vm7_vm0, %v17_v11  }
  0x82   :  { %54 = vst.msk [vmem:[%s118_s1 + $0x4] ss:$8 sm:$0xf] %vm7_vm0, %v29_v12  }
  0x84   :  { %v35_v13 = vpop.permute.xlu0 %34  }
  0x85   :  { %v41_v14 = vpop.permute.xlu1 %40   ;;  %55 = vst.msk [vmem:[%s118_s1 + $0x5] ss:$8 sm:$0xf] %vm7_vm0, %v35_v13  }
  0x86   :  { %56 = vst.msk [vmem:[%s118_s1 + $0x6] ss:$8 sm:$0xf] %vm7_vm0, %v41_v14  }
  0x88   :  { %v47_v15 = vpop.permute.xlu0 %46  }
  0x89   :  { %57 = vst.msk [vmem:[%s118_s1 + $0x7] ss:$8 sm:$0xf] %vm7_vm0, %v47_v15  }

// kernel: tile.6
= control target key start
LH: loop header
LB: loop body
LE: loop exit
PB: predicated region body
PF: predicated region fallthrough
CT: control target
= control target key end

     0   :  { %s28_s0 = inlined_call_operand.vmem [shape: f32[4], index: 0, kind: input, shape index: {}]   ;;  %s29_s1 = inlined_call_operand.vmem [shape: f32[16,4], index: 1, kind: output, shape index: {}]  }
   0x1   :  { %v4_v0 = vld [vmem:[%s28_s0] ss:$0 sm:$0xff] }
   0x2   :  { %5 = vst [vmem:[%s29_s1] sm:$0xff] %v4_v0  ;;  %8 = vst [vmem:[%s29_s1 + $0x8] sm:$0xff] %v4_v0 }

// kernel: model_forward.1
= control target key start
LH: loop header
LB: loop body
LE: loop exit
PB: predicated region body
PF: predicated region fallthrough
CT: control target
= control target key end

     0   :  { %s1307_s11 = smov 0   ;;  %s1496_s0 = inlined_call_operand.vmem [shape: f32[4,64,64], index: 0, kind: input, shape index: {}]   ;;  %s1497_s1 = inlined_call_operand.vmem [shape: f32[64,32], index: 1, kind: input, shape index: {}]   ;;  %s1498_s2 = inlined_call_operand.vmem [shape: f32[1,32], index: 2, kind: input, shape index: {}]   ;;  %s1499_s3 = inlined_call_operand.vmem [shape: f32[32,32], index: 3, kind: input, shape index: {}]   ;;  %s1500_s4 = inlined_call_operand.vmem [shape: f32[1,32], index: 4, kind: input, shape index: {}]   ;;  %s1501_s5 = inlined_call_operand.vmem [shape: f32[32,32], index: 5, kind: input, shape index: {}]   ;;  %s1502_s6 = inlined_call_operand.vmem [shape: f32[1,32], index: 6, kind: input, shape index: {}]   ;;  %s1503_s7 = inlined_call_operand.vmem [shape: f32[2,64], index: 7, kind: input, shape index: {}]   ;;  %s1504_s8 = inlined_call_operand.<no memory space> [shape: f32[1,1], index: 8, kind: input, shape index: {}]   ;;  %s1505_s9 = inlined_call_operand.vmem [shape: f32[4,2,32], index: 9, kind: output, shape index: {}]  }
   0x1   :  { %v14_v0 = vstv %s1504_s8 }
   0x2   :  { %15 = vst [vmem:[#allocation2] sm:$0x1] %v14_v0 }
   0x3 LB: > { %s990_s12 = sadd.s32 4294967295, %s1248_s11   ;;  %p994_p0 = scmp.ge.s32.totalorder %s1248_s11, 1  ;;  %s1248_s11 = sphi %s1307_s11, %s21_s11  }
   0x4   : > { %p289_p1 = scmp.lt.s32.totalorder %s1248_s11, 5 }
   0x6   : > { %p290_p2 = pnand %p994_p0, %p289_p1 }
   0x7   : > { %v341_v1 = vld [vmem:[%s1497_s1] sm:$0xff] (!%p290_p2)  ;;  %v342_v2 = vld [vmem:[%s1497_s1 + $0x8] sm:$0xff] (!%p290_p2)  ;;  %v343_v3 = vld [vmem:[%s1497_s1 + $0x10] sm:$0xff] (!%p290_p2)  ;;  %p324_p3 = scmp.lt.s32.totalorder (!%p290_p2), %s990_s12, 3  ;;  %vm356_vm0 = vcmask (!%p290_p2), 523264   ;;  %v1250_v27 = vmov (!%p290_p2), 0.0|0.0  }
   0x8   : > { %293 = sbr.rel (%p290_p2) target bundleno = 787 (0x313), region = 56  ;;  %v1151_v4 = vpack.c.bf16 (!%p290_p2), %v342_v2, %v341_v1  ;;  %v344_v5 = vld [vmem:[%s1497_s1 + $0x18] sm:$0xff] (!%p290_p2)  ;;  %v345_v7 = vld [vmem:[%s1497_s1 + $0x20] sm:$0xff] (!%p290_p2)  ;;  %v346_v8 = vld [vmem:[%s1497_s1 + $0x28] sm:$0xff] (!%p290_p2)  ;;  %vm1251_vm1 = vmmov (!%p290_p2), 0   ;;  %v1252_v28 = vmov (!%p290_p2), 0.0  }
   0x9   : > { %v1155_v6 = vpack.c.bf16 (!%p290_p2), %v344_v5, %v343_v3  ;;  %v1159_v9 = vpack.c.bf16 (!%p290_p2), %v346_v8, %v345_v7  ;;  %v347_v10 = vld [vmem:[%s1497_s1 + $0x30] sm:$0xff] (!%p290_p2)  ;;  %v348_v11 = vld [vmem:[%s1497_s1 + $0x38] sm:$0xff] (!%p290_p2)  ;;  %v502_v21 = vld [vmem:[%s1499_s3] sm:$0xff] (!%p290_p2)  ;;  %vm513_vm2 = vcmask (!%p290_p2), 261120   ;;  %vm935_vm3 = vcmask (!%p290_p2), 254976  }
   0xa   : > { %1152 = vmatprep.subr.bf16.mxu0 (!%p290_p2), %v1151_v4  ;;  %v1163_v13 = vpack.c.bf16 (!%p290_p2), %v348_v11, %v347_v10  ;;  %v503_v22 = vld [vmem:[%s1499_s3 + $0x8] sm:$0xff] (!%p290_p2)  ;;  %v504_v24 = vld [vmem:[%s1499_s3 + $0x10] sm:$0xff] (!%p290_p2)  ;;  %v505_v25 = vld [vmem:[%s1499_s3 + $0x18] sm:$0xff] (!%p290_p2) }
   0xb   : > { %1154 = vmatpush3.bf16.msra.mxu0 (!%p290_p2), %v1151_v4  ;;  %v1167_v23 = vpack.c.bf16 (!%p290_p2), %v503_v22, %v502_v21  ;;  %v1171_v26 = vpack.c.bf16 (!%p290_p2), %v505_v25, %v504_v24  ;;  %v998_v29 = vld [vmem:[%s1498_s2] ss:$0 sm:$0xff] (!%p290_p2)  ;;  %v675_v36 = vld [vmem:[%s1501_s5 + $0x8] sm:$0xff] (!%p290_p2)  ;;  %v676_v46 = vld [vmem:[%s1501_s5 + $0x10] sm:$0xff] (!%p290_p2) }
   0xc   : > { %1156 = vmatprep.subr.bf16.mxu0 (!%p290_p2), %v1155_v6  ;;  %v674_v35 = vld [vmem:[%s1501_s5] sm:$0xff] (!%p290_p2)  ;;  %v677_v47 = vld [vmem:[%s1501_s5 + $0x18] sm:$0xff] (!%p290_p2) }
   0xd   : > { %1168 = vmatprep.subr.bf16.mxu1 (!%p290_p2), %v1167_v23  ;;  %v1176_v44 = vpack.c.bf16 (!%p290_p2), %v675_v36, %v674_v35  ;;  %v1179_v57 = vpack.c.bf16 (!%p290_p2), %v677_v47, %v676_v46  ;;  %v1007_v46 = vld [vmem:[%s1500_s4] ss:$0 sm:$0xff] (!%p290_p2) }
   0xe   : > { %1170 = vmatpush3.bf16.msra.mxu1 (!%p290_p2), %v1167_v23  ;;  %v678_v47 = vld [vmem:[%s1502_s6] sm:$0x1] (!%p290_p2) }
   0xf   : > { %s1507_s12 = smov (!%p324_p3, %s990_s12), 3  ;;  %1158 = vmatpush3.bf16.msra.mxu0 %v1155_v6  ;;  %1172 = vmatprep.subr.bf16.mxu1 %v1171_v26 }
  0x10   : > { %s1030_s24 = sshll.u32 %s1507_s12, 6  ;;  %1160 = vmatprep.subr.bf16.mxu0 %v1159_v9  ;;  %s997_s16 = sshll.u32 %s1507_s12, 1 }
  0x11   : > { %s328_s27 = scalar_lea.vmem %s1496_s0, %s1030_s24  ;;  %s332_s19 = scalar_lea.vmem %s1505_s9, %s997_s16 }
  0x12   : > { %v333_v12 = vld [vmem:[%s328_s27] sm:$0xff]  ;;  %v334_v14 = vld [vmem:[%s328_s27 + $0x8] sm:$0xff]  ;;  %v335_v15 = vld [vmem:[%s328_s27 + $0x10] sm:$0xff]  ;;  %1174 = vmatpush3.bf16.msra.mxu1 %v1171_v26 }
  0x13   : > { %1089 = vmatprep.mubr.msk.f32.mxu0 %vm356_vm0, %v333_v12  ;;  %1162 = vmatpush3.bf16.msra.mxu0 %v1159_v9  ;;  %v336_v16 = vld [vmem:[%s328_s27 + $0x18] sm:$0xff]  ;;  %v337_v17 = vld [vmem:[%s328_s27 + $0x20] sm:$0xff]  ;;  %v338_v18 = vld [vmem:[%s328_s27 + $0x28] sm:$0xff] }
  0x14   : > { %1164 = vmatprep.subr.bf16.mxu0 %v1163_v13  ;;  %v339_v19 = vld [vmem:[%s328_s27 + $0x30] sm:$0xff]  ;;  %v340_v20 = vld [vmem:[%s328_s27 + $0x38] sm:$0xff]  ;;  %1175 = vmatprep.subr.bf16.mxu1 %v1250_v27  ;;  %v1025_v26 = vld [vmem:[#allocation2] ss:$0 sm:$0xff] }
  0x17   : > { %1166 = vmatpush3.bf16.msra.mxu0 %v1163_v13 }
  0x18   : > { %1181 = vmatprep.subr.bf16.mxu0 %v1250_v27 }
  0x1a   : > { %1090 = vmatmul.mubr.msk.f32.vlgmr.msra.gmra.mrb[0].mxu0 %vm356_vm0, %v334_v14 }
  0x1b   : > { %1092 = vmatprep.mubr.msk.f32.mxu0 %vm356_vm0, %v335_v15 }
  0x1e   : > { %1093 = vmatmul.mubr.msk.f32.gmra.mrb[2].mxu0 %vm356_vm0, %v336_v16 }
  0x1f   : > { %1095 = vmatprep.mubr.msk.f32.mxu0 %vm356_vm0, %v337_v17 }
  0x22   : > { %1096 = vmatmul.mubr.msk.f32.gmra.mrb[4].mxu0 %vm356_vm0, %v338_v18 }
  0x23   : > { %1098 = vmatprep.mubr.msk.f32.mxu0 %vm356_vm0, %v339_v19 }
  0x26   : > { %1099 = vmatmul.mubr.msk.f32.gmra.mrb[6].mxu0 %vm356_vm0, %v340_v20 }
  0x27   : > { %1148 = vmatprep.mubr.msk.f32.mxu0 %vm1251_vm1, %v1252_v28 }
  0xed   : > { %v1091_v30 = vpop.f32.mrb[0].mxu0 }
  0xee   : > { %v1372_v31 = vadd.f32 %v1091_v30, %v998_v29  ;;  %v447_v32 = vpop.f32.mrb[1].mxu0 }
  0xef   : > { %v1374_v33 = vadd.f32 %v998_v29, %v447_v32 }
  0xf0   : > { %v487_v34 = vmax.f32 %v1372_v31, 0.0 }
  0xf1   : > { %v1094_v37 = vpop.f32.mrb[2].mxu0  ;;  %v486_v38 = vmax.f32 %v1374_v33, 0.0 }
  0xf2   : > { %v495_v39 = vadd.f32 %v487_v34, %v1372_v31  ;;  %v1387_v40 = vadd.f32 %v1094_v37, %v998_v29  ;;  %v457_v41 = vpop.f32.mrb[3].mxu0 }
  0xf3   : > { %v1389_v42 = vadd.f32 %v998_v29, %v457_v41  ;;  %v494_v43 = vadd.f32 %v486_v38, %v1374_v33 }
  0xf4   : > { %v489_v45 = vmax.f32 %v1387_v40, 0.0  ;;  %v652_v51 = vsel %vm513_vm2, %v495_v39, 0.0 }
  0xf5   : > { %v488_v48 = vmax.f32 %v1389_v42, 0.0  ;;  %v1097_v49 = vpop.f32.mrb[4].mxu0  ;;  %1109 = vmatprep.mubr.msk.f32.mxu1 %vm513_vm2, %v494_v43  ;;  %v651_v50 = vsel %vm513_vm2, %v494_v43, 0.0  ;;  %v753_v43 = vlaneseq }
  0xf6   : > { %v1405_v52 = vadd.f32 %v1097_v49, %v998_v29  ;;  %v467_v53 = vpop.f32.mrb[5].mxu0  ;;  %1110 = vmatmul.mubr.msk.f32.vlgmr.msra.gmra.mrb[0].mxu1 %vm513_vm2, %v495_v39  ;;  %v497_v54 = vadd.f32 %v489_v45, %v1387_v40  ;;  %v653_v59 = vadd.f32 %v652_v51, %v651_v50 }
  0xf7   : > { %v496_v55 = vadd.f32 %v488_v48, %v1389_v42  ;;  %v1414_v56 = vadd.f32 %v998_v29, %v467_v53  ;;  %1177 = vmatpush3.bf16.msra.mxu1 %v1176_v44  ;;  %v754_v44 = vshrl.u32 %v753_v43, 7 }
  0xf8   : > { %v491_v58 = vmax.f32 %v1405_v52, 0.0  ;;  %1178 = vmatprep.subr.bf16.mxu1 %v1250_v27  ;;  %v656_v2 = vsel %vm513_vm2, %v497_v54, 0.0 }
  0xf9   : > { %v654_v60 = vsel %vm513_vm2, %v496_v55, 0.0  ;;  %v490_v61 = vmax.f32 %v1414_v56, 0.0  ;;  %v1100_v62 = vpop.f32.mrb[6].mxu0  ;;  %1112 = vmatprep.mubr.msk.f32.mxu1 %vm513_vm2, %v496_v55  ;;  %v755_v51 = vsub.s32 0, %v754_v44 }
  0xfa   : > { %v655_v63 = vadd.f32 %v654_v60, %v653_v59  ;;  %v1421_v0 = vadd.f32 %v1100_v62, %v998_v29  ;;  %v477_v1 = vpop.f32.mrb[7].mxu0  ;;  %1113 = vmatmul.mubr.msk.f32.gmra.mrb[2].mxu1 %vm513_vm2, %v497_v54  ;;  %v499_v3 = vadd.f32 %v491_v58, %v1405_v52 }
  0xfb   : > { %v498_v4 = vadd.f32 %v490_v61, %v1414_v56  ;;  %v1431_v5 = vadd.f32 %v998_v29, %v477_v1  ;;  %1180 = vmatpush3.bf16.msra.mxu1 %v1179_v57  ;;  %v1253_v29 = vmov 0  }
  0xfc   : > { %v657_v6 = vadd.f32 %v656_v2, %v655_v63  ;;  %v493_v7 = vmax.f32 %v1421_v0, 0.0  ;;  %v660_v11 = vsel %vm513_vm2, %v499_v3, 0.0  ;;  %1205 = vset.pattern.permute.xlu0 %v1253_v29 }
  0xfd   : > { %v658_v8 = vsel %vm513_vm2, %v498_v4, 0.0  ;;  %v492_v9 = vmax.f32 %v1431_v5, 0.0  ;;  %1115 = vmatprep.mubr.msk.f32.mxu1 %vm513_vm2, %v498_v4  ;;  %853 = vperm.xlu0 %1205, %v1025_v26  }
  0xfe   : > { %v659_v10 = vadd.f32 %v658_v8, %v657_v6  ;;  %1116 = vmatmul.mubr.msk.f32.gmra.mrb[4].mxu1 %vm513_vm2, %v499_v3  ;;  %v501_v12 = vadd.f32 %v493_v7, %v1421_v0 }
  0xff   : > { %v500_v13 = vadd.f32 %v492_v9, %v1431_v5 }
 0x100   : > { %v661_v14 = vadd.f32 %v660_v11, %v659_v10  ;;  %v664_v17 = vsel %vm513_vm2, %v501_v12, 0.0 }
 0x101   : > { %v662_v15 = vsel %vm513_vm2, %v500_v13, 0.0  ;;  %1118 = vmatprep.mubr.msk.f32.mxu1 %vm513_vm2, %v500_v13 }
 0x102   : > { %v663_v16 = vadd.f32 %v662_v15, %v661_v14  ;;  %1119 = vmatmul.mubr.msk.f32.gmra.mrb[6].mxu1 %vm513_vm2, %v501_v12 }
 0x103   : > { %1129 = vmatprep.mubr.msk.f32.mxu1 %vm1251_vm1, %v1252_v28 }
 0x104   : > { %v665_v18 = vadd.f32 %v664_v17, %v663_v16 }
 0x106   : > { %v666_v19 = vrot.slane %v665_v18, 4 }
 0x108   : > { %v667_v20 = vadd.f32 %v666_v19, %v665_v18 }
 0x10a   : > { %v668_v21 = vrot.slane %v667_v20, 2 }
 0x10c   : > { %v669_v22 = vadd.f32 %v668_v21, %v667_v20 }
 0x10e   : > { %v670_v23 = vrot.slane %v669_v22, 1 }
 0x110   : > { %v671_v24 = vadd.f32 %v670_v23, %v669_v22 }
 0x112   : > { %v673_v25 = vmul.f32 0.015625, %v671_v24 }
 0x114   : > { %1130 = vmatmul.mubr.msk.f32.vlgmr.msra.gmra.mrb[8].mxu1 %vm513_vm2, %v673_v25 }
 0x1c9   : > { %v1111_v30 = vpop.f32.mrb[0].mxu1 }
 0x1ca   : > { %v604_v32 = vpop.f32.mrb[1].mxu1  ;;  %v610_v49 = vadd.f32 %v1111_v30, %v1007_v46 }
 0x1cb   : > { %v605_v53 = vadd.f32 %v1007_v46, %v604_v32 }
 0x1cc   : > { %v644_v3 = vmax.f32 %v610_v49, 0.0 }
 0x1cd   : > { %v1114_v35 = vpop.f32.mrb[2].mxu1  ;;  %v643_v4 = vmax.f32 %v605_v53, 0.0 }
 0x1ce   : > { %v614_v36 = vpop.f32.mrb[3].mxu1  ;;  %v620_v54 = vadd.f32 %v1114_v35, %v1007_v46 }
 0x1cf   : > { %v615_v55 = vadd.f32 %v1007_v46, %v614_v36 }
 0x1d0   : > { %v646_v6 = vmax.f32 %v620_v54, 0.0 }
 0x1d1   : > { %v1117_v37 = vpop.f32.mrb[4].mxu1  ;;  %v645_v8 = vmax.f32 %v615_v55, 0.0 }
 0x1d2   : > { %v624_v28 = vpop.f32.mrb[5].mxu1  ;;  %v630_v60 = vadd.f32 %v1117_v37, %v1007_v46 }
 0x1d3   : > { %v625_v62 = vadd.f32 %v1007_v46, %v624_v28 }
 0x1d4   : > { %v648_v11 = vmax.f32 %v630_v60, 0.0 }
 0x1d5   : > { %v1120_v39 = vpop.f32.mrb[6].mxu1  ;;  %v647_v12 = vmax.f32 %v625_v62, 0.0 }
 0x1d6   : > { %v634_v41 = vpop.f32.mrb[7].mxu1  ;;  %v640_v63 = vadd.f32 %v1120_v39, %v1007_v46 }
 0x1d7   : > { %v635_v1 = vadd.f32 %v1007_v46, %v634_v41 }
 0x1d8   : > { %v650_v13 = vmax.f32 %v640_v63, 0.0 }
 0x1d9   : > { %v649_v14 = vmax.f32 %v635_v1, 0.0 }
 0x1e7   : > { %v748_v50 = vpop.f32.mrb[8].mxu1 }
 0x1e8   : > { %v749_v57 = vadd.f32 %v748_v50, %v678_v47  ;;  %v1131_v59 = vpop.f32.mrb[9].mxu1 }
 0x1ea   : > { %v752_v2 = vmax.f32 %v749_v57, 0.0 }
 0x1ec   : > { %v756_v10 = vrot.slane %v752_v2, %v755_v51 }
 0x1ee   : > { %v757_v15 = vadd.f32 %v756_v10, %v643_v4  ;;  %v758_v16 = vadd.f32 %v756_v10, %v644_v3  ;;  %v759_v17 = vadd.f32 %v756_v10, %v645_v8  ;;  %v760_v18 = vadd.f32 %v756_v10, %v646_v6 }
 0x1ef   : > { %v761_v19 = vadd.f32 %v756_v10, %v647_v12  ;;  %v762_v20 = vadd.f32 %v756_v10, %v648_v11  ;;  %v763_v21 = vadd.f32 %v756_v10, %v649_v14  ;;  %v764_v22 = vadd.f32 %v756_v10, %v650_v13 }
 0x1f0   : > { %v1017_v23 = vmul.f32 -1.442695, %v757_v15  ;;  %v1018_v24 = vmul.f32 -1.442695, %v758_v16  ;;  %v1019_v25 = vmul.f32 -1.442695, %v759_v17 }
 0x1f1   : > { %v1020_v26 = vmul.f32 -1.442695, %v760_v18  ;;  %v1021_v29 = vmul.f32 -1.442695, %v761_v19  ;;  %v1022_v30 = vmul.f32 -1.442695, %v762_v20 }
 0x1f2   : > { %1206 = vpow2.f32 %v1017_v23  ;;  %v1023_v32 = vmul.f32 -1.442695, %v763_v21  ;;  %v1024_v35 = vmul.f32 -1.442695, %v764_v22 }
 0x1f3   : > { %1208 = vpow2.f32 %v1018_v24 }
 0x1f4   : > { %1210 = vpow2.f32 %v1019_v25 }
 0x1f5   : > { %1212 = vpow2.f32 %v1020_v26 }
 0x1f6   : > { %1214 = vpow2.f32 %v1021_v29 }
 0x1f7   : > { %1216 = vpow2.f32 %v1022_v30 }
 0x1f8   : > { %1218 = vpow2.f32 %v1023_v32 }
 0x1f9   : > { %1220 = vpow2.f32 %v1024_v35 }
 0x1fc   : > { %v1207_v36 = vpop.eup %1206 }
 0x1fd   : > { %v1209_v37 = vpop.eup %1208  ;;  %v789_v28 = vadd.f32 1.0, %v1207_v36 }
 0x1fe   : > { %v1211_v39 = vpop.eup %1210  ;;  %v790_v41 = vadd.f32 1.0, %v1209_v37 }
 0x1ff   : > { %v1213_v43 = vpop.eup %1212  ;;  %1222 = vrcp.f32 %v789_v28  ;;  %v791_v44 = vadd.f32 1.0, %v1211_v39 }
 0x200   : > { %v1215_v46 = vpop.eup %1214  ;;  %1224 = vrcp.f32 %v790_v41  ;;  %v792_v47 = vadd.f32 1.0, %v1213_v43 }
 0x201   : > { %v1217_v49 = vpop.eup %1216  ;;  %1226 = vrcp.f32 %v791_v44  ;;  %v793_v50 = vadd.f32 1.0, %v1215_v46 }
 0x202   : > { %v1219_v51 = vpop.eup %1218  ;;  %1228 = vrcp.f32 %v792_v47  ;;  %v794_v53 = vadd.f32 1.0, %v1217_v49 }
 0x203   : > { %v1221_v54 = vpop.eup %1220  ;;  %1230 = vrcp.f32 %v793_v50  ;;  %v795_v55 = vadd.f32 1.0, %v1219_v51 }
 0x204   : > { %1232 = vrcp.f32 %v794_v53  ;;  %v796_v57 = vadd.f32 1.0, %v1221_v54 }
 0x205   : > { %1234 = vrcp.f32 %v795_v55 }
 0x206   : > { %1236 = vrcp.f32 %v796_v57 }
 0x209   : > { %v1223_v59 = vpop.eup %1222 }
 0x20a   : > { %v1225_v60 = vpop.eup %1224  ;;  %v821_v62 = vsub.f32 1.0, %v1223_v59  ;;  %v813_v3 = vmul.f32 %v1223_v59, %v486_v38 }
 0x20b   : > { %v1227_v63 = vpop.eup %1226  ;;  %v822_v1 = vsub.f32 1.0, %v1225_v60  ;;  %v814_v10 = vmul.f32 %v1225_v60, %v487_v34 }
 0x20c   : > { %v1229_v2 = vpop.eup %1228  ;;  %v829_v4 = vmul.f32 %v821_v62, %v1374_v33  ;;  %v823_v6 = vsub.f32 1.0, %v1227_v63  ;;  %v815_v15 = vmul.f32 %v1227_v63, %v488_v48 }
 0x20d   : > { %v1231_v8 = vpop.eup %1230  ;;  %v830_v11 = vmul.f32 %v822_v1, %v1372_v31  ;;  %v824_v12 = vsub.f32 1.0, %v1229_v2  ;;  %v816_v33 = vmul.f32 %v1229_v2, %v489_v45 }
 0x20e   : > { %v1233_v13 = vpop.eup %1232  ;;  %v837_v14 = vadd.f32 %v829_v4, %v813_v3  ;;  %v831_v16 = vmul.f32 %v823_v6, %v1389_v42  ;;  %v825_v17 = vsub.f32 1.0, %v1231_v8  ;;  %v817_v31 = vmul.f32 %v1231_v8, %v490_v61 }
 0x20f   : > { %v1235_v18 = vpop.eup %1234  ;;  %v838_v38 = vadd.f32 %v830_v11, %v814_v10  ;;  %v832_v19 = vmul.f32 %v824_v12, %v1387_v40  ;;  %v826_v20 = vsub.f32 1.0, %v1233_v13  ;;  %v818_v42 = vmul.f32 %v1233_v13, %v491_v58 }
 0x210   : > { %v1237_v34 = vpop.eup %1236  ;;  %v839_v21 = vadd.f32 %v831_v16, %v815_v15  ;;  %v833_v22 = vmul.f32 %v825_v17, %v1414_v56  ;;  %v827_v23 = vsub.f32 1.0, %v1235_v18  ;;  %v819_v40 = vmul.f32 %v1235_v18, %v492_v9 }
 0x211   : > { %v1182_v48 = vpack.c.bf16 %v838_v38, %v837_v14  ;;  %v840_v24 = vadd.f32 %v832_v19, %v816_v33  ;;  %v834_v25 = vmul.f32 %v826_v20, %v1405_v52  ;;  %v828_v45 = vsub.f32 1.0, %v1237_v34 }
 0x212   : > { %v841_v26 = vadd.f32 %v833_v22, %v817_v31  ;;  %v835_v29 = vmul.f32 %v827_v23, %v1431_v5  ;;  %v820_v56 = vmul.f32 %v1237_v34, %v493_v7  ;;  %v845_v5 = vld [vmem:[%s1503_s7] sm:$0x3]  ;;  %v854_v7 = vpop.permute.xlu0 %853 }
 0x213   : > { %1183 = vmatpush3.bf16.msra.mxu0 %v1182_v48  ;;  %v1185_v30 = vpack.c.bf16 %v840_v24, %v839_v21  ;;  %v842_v61 = vadd.f32 %v834_v25, %v818_v42  ;;  %v836_v32 = vmul.f32 %v828_v45, %v1421_v0 }
 0x214   : > { %1184 = vmatprep.subr.bf16.mxu0 %v1250_v27  ;;  %v843_v58 = vadd.f32 %v835_v29, %v819_v40 }
 0x215   : > { %v1188_v35 = vpack.c.bf16 %v842_v61, %v841_v26  ;;  %v844_v52 = vadd.f32 %v836_v32, %v820_v56 }
 0x217   : > { %1186 = vmatpush3.bf16.msra.mxu0 %v1185_v30  ;;  %v1191_v9 = vpack.c.bf16 %v844_v52, %v843_v58 }
 0x218   : > { %1187 = vmatprep.subr.bf16.mxu0 %v1250_v27 }
 0x21b   : > { %1189 = vmatpush3.bf16.msra.mxu0 %v1188_v35 }
 0x21c   : > { %1190 = vmatprep.subr.bf16.mxu0 %v1250_v27 }
 0x21f   : > { %1192 = vmatpush3.bf16.msra.mxu0 %v1191_v9 }
 0x222   : > { %1149 = vmatmul.mubr.msk.f32.vlgmr.msra.gmra.mrb[8].mxu0 %vm356_vm0, %v845_v5 }
 0x2f5   : > { %v925_v0 = vpop.f32.mrb[8].mxu0 }
 0x2f6   : > { %v926_v36 = vadd.f32 %v925_v0, %v854_v7  ;;  %v1150_v37 = vpop.f32.mrb[9].mxu0 }
 0x2f8   : > { %v1027_v28 = vmul.f32 -1.442695, %v926_v36 }
 0x2fa   : > { %1238 = vpow2.f32 %v1027_v28 }
 0x304   : > { %v1239_v39 = vpop.eup %1238 }
 0x305   : > { %v932_v41 = vadd.f32 1.0, %v1239_v39 }
 0x307   : > { %1240 = vrcp.f32 %v932_v41 }
 0x311   : > { %v1241_v27 = vpop.eup %1240 }
 0x312   : > { %936 = vst.msk [vmem:[%s332_s19] sm:$0x3] %vm935_vm3, %v1241_v27 }
 0x313 PF: > { %s21_s11 = sadd.s32 1, %s1248_s11  }
 0x314   : > { %p18_p4 = scmp.ge.s32.totalorder %s21_s11, 6  }
 0x316   :  { %20 = sbr.rel (!%p18_p4) target bundleno = 3 (0x3), region = 86 }

</bundles_post_ra>
